<compile_context>
chip_gen: v5e
topology: v5e:2x2
jax: 0.10.0
libtpu: 0.0.40
codegen_flags: <defaults>
</compile_context>

<pallas_src>
import functools
import math

import jax
import jax.numpy as jnp
from jax import lax
from jax.experimental import pallas as pl
from jax.experimental.pallas import tpu as pltpu

_MB = 1024 * 1024
# dtype itemsize -> minimal sublane multiple for packed vreg tiles.
_SUBLANE = {4: 8, 2: 16, 1: 32}


# ----------------------------------------------------------------------------
# Pallas kernel: fused (ReLU +) per-row affine modulation  out = act(x)*s + t
# ----------------------------------------------------------------------------

def _stylemod_kernel(ss_ref, x_ref, o_ref, *, relu):
    # ss_ref: (TR, 2) f32, packed [scale, shift] per (batch, channel) row.
    # x_ref / o_ref: (TR, THW); rows = (b, c) on sublanes, spatial on lanes.
    x = x_ref[...].astype(jnp.float32)
    if relu:
        x = jnp.maximum(x, 0.0)
    ss = ss_ref[...]
    o_ref[...] = (x * ss[:, 0:1] + ss[:, 1:2]).astype(o_ref.dtype)


def _round_up(n, m):
    return ((n + m - 1) // m) * m


def _round_down(n, m):
    return (n // m) * m


def _vmem_capacity_bytes():
    try:
        return int(pltpu.get_tpu_info().vmem_capacity_bytes)
    except Exception:  # info API unavailable -> fall back to conservative defaults
        return None


def _choose_tiles(R, HW, itemsize):
    """Pick (TR, THW, R_pad, HW_pad, grid) for a (R, HW) elementwise pass."""
    sub = _SUBLANE.get(itemsize, 8)
    vmem = _vmem_capacity_bytes()
    # 64 MiB VMEM per core => v7x-like: ~3.2 TB/s HBM, favor bigger blocks.
    small_vmem_chip = vmem is not None and vmem <= 64 * _MB
    hw_target = 8192 if small_vmem_chip else 4096
    block_target = (8 if small_vmem_chip else 4) * _MB

    # Lane (spatial) axis: full-dim block when it fits (always legal), otherwise
    # near-target 128-aligned tiles balanced across the grid (never collapse to 128).
    if HW <= hw_target:
        n_hw, THW = 1, HW
    else:
        n_hw = pl.cdiv(HW, hw_target)
        THW = _round_up(pl.cdiv(HW, n_hw), 128)
    HW_pad = n_hw * THW

    # Sublane (row) axis: size rows so one block is ~block_target bytes.
    row_target = block_target // max(1, THW * itemsize)
    row_target = max(sub, min(2048, _round_down(row_target, sub)))
    if R <= row_target:
        n_r, TR = 1, _round_up(R, sub)
    else:
        n_r = pl.cdiv(R, row_target)
        TR = _round_up(pl.cdiv(R, n_r), sub)
    R_pad = n_r * TR

    # Guarantee >= 2 grid steps on a "parallel" axis so both v7x TensorCores
    # (each with its own HBM pipe) get work.  Harmless on single-TC v5e/v6e.
    if n_r == 1 and n_hw == 1:
        if HW >= 256 and HW % 256 == 0:
            THW, n_hw, HW_pad = HW // 2, 2, HW
        elif R > sub:
            n_r = 2
            TR = _round_up(pl.cdiv(R, 2), sub)
            R_pad = n_r * TR

    return TR, THW, R_pad, HW_pad, (n_r, n_hw)


def _modulate(x, scale, shift, *, relu):
    """out[b,c,h,w] = (max(x,0) if relu else x) * scale[b,c] + shift[b,c].

    x: [B, C, H, W]; scale/shift: [B, C].  One HBM pass over x, lane-dense tiles.
    """
    B, C, H, W = x.shape
    R, HW = B * C, H * W
    itemsize = jnp.dtype(x.dtype).itemsize
    TR, THW, R_pad, HW_pad, grid = _choose_tiles(R, HW, itemsize)

    x2 = x.reshape(R, HW)  # contiguous merge -> free
    if (R_pad, HW_pad) != (R, HW):
        # Only for misaligned shapes; this net's power-of-two maps never hit it.
        x2 = jnp.pad(x2, ((0, R_pad - R), (0, HW_pad - HW)))

    ss = jnp.stack([scale.astype(jnp.float32).reshape(R),
                    shift.astype(jnp.float32).reshape(R)], axis=-1)  # (R, 2)
    if R_pad != R:
        ss = jnp.pad(ss, ((0, R_pad - R), (0, 0)))

    block_bytes = TR * THW * itemsize
    vmem_need = 4 * block_bytes + 4 * TR * 2 * 4 + 2 * _MB   # x/o double-buffered + ss
    vmem_limit = int(min(48 * _MB, max(32 * _MB, vmem_need + 8 * _MB)))

    cparams_kw = dict(dimension_semantics=("parallel", "parallel"),
                      vmem_limit_bytes=vmem_limit)
    try:
        # Let XLA fuse x's producer (reshape / pad / conv epilogue) into the input.
        cparams = pltpu.CompilerParams(allow_input_fusion=[False, True], **cparams_kw)
    except TypeError:
        cparams = pltpu.CompilerParams(**cparams_kw)

    cost = pl.CostEstimate(
        flops=(3 if relu else 2) * R * HW,
        transcendentals=0,
        bytes_accessed=2 * R * HW * itemsize + R * 2 * 4,
    )

    out = pl.pallas_call(
        functools.partial(_stylemod_kernel, relu=relu),
        out_shape=jax.ShapeDtypeStruct((R_pad, HW_pad), x.dtype),
        grid_spec=pltpu.PrefetchScalarGridSpec(
            num_scalar_prefetch=0,
            grid=grid,
            in_specs=[pl.BlockSpec((TR, 2), lambda ri, hi: (ri, 0)),
                      pl.BlockSpec((TR, THW), lambda ri, hi: (ri, hi))],
            out_specs=pl.BlockSpec((TR, THW), lambda ri, hi: (ri, hi)),
        ),
        compiler_params=cparams,
        cost_estimate=cost,
    )(ss, x2)

    if (R_pad, HW_pad) != (R, HW):
        out = out[:R, :HW]
    return out.reshape(B, C, H, W)


def stylemod(x, style=None, condition=None, w=None, b=None, *, fuse_relu=False):
    """StyleMod forward. x: [B,C,H,W]; w: [D, 2C] (torch Linear weight transposed);
    b: [2C]. If both style and condition are None -> pass-through."""
    if style is None and condition is None:
        return x
    if condition is not None:
        s = jnp.concatenate([style, condition], axis=1) if style is not None else condition
    else:
        s = style
    C = x.shape[1]
    st = s.astype(jnp.float32) @ w.astype(jnp.float32) + b.astype(jnp.float32)
    return _modulate(x, st[:, :C], st[:, C:], relu=fuse_relu)


# ----------------------------------------------------------------------------
# ConditionalDiscriminator (params + forward) — convs/pooling/dense via lax/jnp.
# ----------------------------------------------------------------------------

def _uniform(key, shape, bound):
    return jax.random.uniform(key, shape, jnp.float32, -bound, bound)


def init_linear(key, in_dim, out_dim):
    k1, k2 = jax.random.split(key)
    bound = 1.0 / math.sqrt(in_dim)
    # weight stored as [in_dim, out_dim] (transpose of torch's [out, in])
    return {"w": _uniform(k1, (in_dim, out_dim), bound),
            "b": _uniform(k2, (out_dim,), bound)}


def init_conv(key, in_c, out_c, ksize=3):
    k1, k2 = jax.random.split(key)
    bound = 1.0 / math.sqrt(in_c * ksize * ksize)
    return {"w": _uniform(k1, (out_c, in_c, ksize, ksize), bound),
            "b": _uniform(k2, (out_c,), bound)}


def init_discriminator(key, *, z_dim, d_model, obs_shape, num_layers):
    num_channels, _, _ = obs_shape
    keys = list(jax.random.split(key, 2 + 3 * num_layers))
    params = {"mapping": init_linear(keys.pop(0), z_dim, d_model), "blocks": []}
    in_c = num_channels
    out_c = in_c
    for i in range(num_layers):
        out_c = min(d_model, d_model // 2 ** (num_layers - i - 1))
        params["blocks"].append({
            "conv1": init_conv(keys.pop(0), in_c, out_c),
            "style_lin": init_linear(keys.pop(0), d_model, 2 * out_c),
            "conv2": init_conv(keys.pop(0), out_c, out_c),
        })
        in_c = out_c
    params["final"] = init_linear(keys.pop(0), out_c, d_model)
    return params


def conv2d_same(x, w, b):
    y = lax.conv_general_dilated(
        x, w, window_strides=(1, 1), padding="SAME",
        dimension_numbers=("NCHW", "OIHW", "NCHW"))
    return y + b[None, :, None, None]


def max_pool_2x2(x):
    return lax.reduce_window(
        x, -jnp.inf, lax.max,
        window_dimensions=(1, 1, 2, 2),
        window_strides=(1, 1, 2, 2),
        padding="VALID")


def discriminator_forward(params, img, e, *, use_pallas=True):
    # Mapping network: Linear + ReLU (tiny; plain jnp).
    style = jnp.maximum(e @ params["mapping"]["w"] + params["mapping"]["b"], 0.0)
    x = img
    for blk in params["blocks"]:
        x = conv2d_same(x, blk["conv1"]["w"], blk["conv1"]["b"])
        C = x.shape[1]
        st = style @ blk["style_lin"]["w"] + blk["style_lin"]["b"]  # hoisted tiny matmul
        scale, shift = st[:, :C], st[:, C:]
        if use_pallas:
            x = _modulate(x, scale, shift, relu=True)   # fused ReLU + StyleMod, 1 HBM pass
        else:
            x = jnp.maximum(x, 0.0)
            x = x * scale[:, :, None, None] + shift[:, :, None, None]
        x = conv2d_same(x, blk["conv2"]["w"], blk["conv2"]["b"])
        # ReLU + 2x2 max-pool left to XLA so the ReLU fuses into conv2's epilogue /
        # the pool reduction (a standalone Pallas ReLU would add a full extra pass).
        x = max_pool_2x2(jnp.maximum(x, 0.0))
    pooled = jnp.mean(x, axis=(2, 3))                   # AdaptiveAvgPool2d(1) + Flatten
    return pooled @ params["final"]["w"] + params["final"]["b"]


if __name__ == "__main__":
    B = 2
    obs_shape = (4, 16, 16)   # (C, H, W)
    z_dim = 8
    d_model = 32
    num_layers = 2

    key = jax.random.PRNGKey(0)
    k_params, k_img, k_e, k_xs, k_ss, k_cs, k_ws, k_bs = jax.random.split(key, 8)

    params = init_discriminator(k_params, z_dim=z_dim, d_model=d_model,
                                obs_shape=obs_shape, num_layers=num_layers)
    img = jax.random.normal(k_img, (B,) + obs_shape, dtype=jnp.float32)
    e = jax.random.normal(k_e, (B, z_dim), dtype=jnp.float32)

    fwd_pallas = jax.jit(functools.partial(discriminator_forward, use_pallas=True))
    fwd_ref = jax.jit(functools.partial(discriminator_forward, use_pallas=False))

    # Full ConditionalDiscriminator forward with the Pallas kernel.
    out = jax.block_until_ready(fwd_pallas(params, img, e))
    assert out.shape == (B, d_model)

    # Pure-JAX reference (same params, same lax convs, jnp elementwise).
    ref = jax.block_until_ready(fwd_ref(params, img, e))
    assert jnp.allclose(out, ref, atol=1e-4, rtol=1e-4), "discriminator mismatch"

    # Standalone StyleMod sanity check (style + condition, no ReLU fusion).
    C_s, style_dim, cond_dim = 4, 8, 8
    D_s = style_dim + cond_dim
    x_s = jax.random.normal(k_xs, (B, C_s, 16, 16), dtype=jnp.float32)
    s_s = jax.random.normal(k_ss, (B, style_dim), dtype=jnp.float32)
    c_s = jax.random.normal(k_cs, (B, cond_dim), dtype=jnp.float32)
    bound = 1.0 / math.sqrt(D_s)
    w_s = jax.random.uniform(k_ws, (D_s, 2 * C_s), jnp.float32, -bound, bound)
    b_s = jax.random.uniform(k_bs, (2 * C_s,), jnp.float32, -bound, bound)

    sm_out = jax.block_until_ready(stylemod(x_s, style=s_s, condition=c_s, w=w_s, b=b_s))
    st = jnp.concatenate([s_s, c_s], axis=1) @ w_s + b_s
    sm_ref = x_s * st[:, :C_s][:, :, None, None] + st[:, C_s:][:, :, None, None]
    assert jnp.allclose(sm_out, sm_ref, atol=1e-5, rtol=1e-5), "stylemod mismatch"

    print("KERNEL_OK")
</pallas_src>

<mosaic_0001>
module attributes {stable_mosaic.version = 11 : i64} {
  func.func @_stylemod_kernel(%arg0: i32, %arg1: i32, %arg2: memref<32x2xf32, #tpu.memory_space<vmem>>, %arg3: memref<32x128xf32, #tpu.memory_space<vmem>>, %arg4: memref<32x128xf32, #tpu.memory_space<vmem>>) attributes {dimension_semantics = [#tpu.dimension_semantics<parallel>, #tpu.dimension_semantics<parallel>], iteration_bounds = array<i64: 1, 2>, scalar_prefetch = 0 : i64, scratch_operands = 0 : i64, tpu.core_type = #tpu.core_type<tc>, window_params = [{transform_indices = @transform_0, window_bounds = array<i64: 32, 2>}, {transform_indices = @transform_1, window_bounds = array<i64: 32, 128>}, {transform_indices = @transform_2, window_bounds = array<i64: 32, 128>}]} {
    %c0 = arith.constant 0 : index
    %c0_0 = arith.constant 0 : index
    %0 = vector.load %arg3[%c0, %c0_0] : memref<32x128xf32, #tpu.memory_space<vmem>>, vector<32x128xf32>
    %cst = arith.constant 0.000000e+00 : f32
    %1 = vector.broadcast %cst : f32 to vector<32x128xf32>
    %2 = arith.maximumf %0, %1 : vector<32x128xf32>
    %c0_1 = arith.constant 0 : index
    %c0_2 = arith.constant 0 : index
    %3 = vector.load %arg2[%c0_1, %c0_2] : memref<32x2xf32, #tpu.memory_space<vmem>>, vector<32x2xf32>
    %4 = vector.extract_strided_slice %3 {offsets = [0, 0], sizes = [32, 1], strides = [1, 1]} : vector<32x2xf32> to vector<32x1xf32>
    %5 = vector.broadcast %4 : vector<32x1xf32> to vector<32x128xf32>
    %6 = arith.mulf %2, %5 : vector<32x128xf32>
    %7 = vector.extract_strided_slice %3 {offsets = [0, 1], sizes = [32, 1], strides = [1, 1]} : vector<32x2xf32> to vector<32x1xf32>
    %8 = vector.broadcast %7 : vector<32x1xf32> to vector<32x128xf32>
    %9 = arith.addf %6, %8 : vector<32x128xf32>
    %c0_3 = arith.constant 0 : index
    %c0_4 = arith.constant 0 : index
    %10 = vector.load %arg4[%c0_3, %c0_4] : memref<32x128xf32, #tpu.memory_space<vmem>>, vector<32x128xf32>
    tpu.vector_store %arg4[%c0_3, %c0_4], %9 {strides = array<i32>} : memref<32x128xf32, #tpu.memory_space<vmem>>, vector<32x128xf32>,
    return
  }
  func.func @transform_0(%arg0: i32, %arg1: i32) -> (i32, i32) {
    %c0_i32 = arith.constant 0 : i32
    %c0_i32_0 = arith.constant 0 : i32
    return %arg0, %c0_i32 : i32, i32
  }
  func.func @transform_1(%arg0: i32, %arg1: i32) -> (i32, i32) {
    %c0_i32 = arith.constant 0 : i32
    return %arg0, %arg1 : i32, i32
  }
  func.func @transform_2(%arg0: i32, %arg1: i32) -> (i32, i32) {
    %c0_i32 = arith.constant 0 : i32
    return %arg0, %arg1 : i32, i32
  }
}

module attributes {stable_mosaic.version = 11 : i64} {
  func.func @_stylemod_kernel(%arg0: i32, %arg1: i32, %arg2: memref<32x2xf32, #tpu.memory_space<vmem>>, %arg3: memref<32x64xf32, #tpu.memory_space<vmem>>, %arg4: memref<32x64xf32, #tpu.memory_space<vmem>>) attributes {dimension_semantics = [#tpu.dimension_semantics<parallel>, #tpu.dimension_semantics<parallel>], iteration_bounds = array<i64: 2, 1>, scalar_prefetch = 0 : i64, scratch_operands = 0 : i64, tpu.core_type = #tpu.core_type<tc>, window_params = [{transform_indices = @transform_0, window_bounds = array<i64: 32, 2>}, {transform_indices = @transform_1, window_bounds = array<i64: 32, 64>}, {transform_indices = @transform_2, window_bounds = array<i64: 32, 64>}]} {
    %c0 = arith.constant 0 : index
    %c0_0 = arith.constant 0 : index
    %0 = vector.load %arg3[%c0, %c0_0] : memref<32x64xf32, #tpu.memory_space<vmem>>, vector<32x64xf32>
    %cst = arith.constant 0.000000e+00 : f32
    %1 = vector.broadcast %cst : f32 to vector<32x64xf32>
    %2 = arith.maximumf %0, %1 : vector<32x64xf32>
    %c0_1 = arith.constant 0 : index
    %c0_2 = arith.constant 0 : index
    %3 = vector.load %arg2[%c0_1, %c0_2] : memref<32x2xf32, #tpu.memory_space<vmem>>, vector<32x2xf32>
    %4 = vector.extract_strided_slice %3 {offsets = [0, 0], sizes = [32, 1], strides = [1, 1]} : vector<32x2xf32> to vector<32x1xf32>
    %5 = vector.broadcast %4 : vector<32x1xf32> to vector<32x64xf32>
    %6 = arith.mulf %2, %5 : vector<32x64xf32>
    %7 = vector.extract_strided_slice %3 {offsets = [0, 1], sizes = [32, 1], strides = [1, 1]} : vector<32x2xf32> to vector<32x1xf32>
    %8 = vector.broadcast %7 : vector<32x1xf32> to vector<32x64xf32>
    %9 = arith.addf %6, %8 : vector<32x64xf32>
    %c0_3 = arith.constant 0 : index
    %c0_4 = arith.constant 0 : index
    %10 = vector.load %arg4[%c0_3, %c0_4] : memref<32x64xf32, #tpu.memory_space<vmem>>, vector<32x64xf32>
    tpu.vector_store %arg4[%c0_3, %c0_4], %9 {strides = array<i32>} : memref<32x64xf32, #tpu.memory_space<vmem>>, vector<32x64xf32>,
    return
  }
  func.func @transform_0(%arg0: i32, %arg1: i32) -> (i32, i32) {
    %c0_i32 = arith.constant 0 : i32
    %c0_i32_0 = arith.constant 0 : i32
    return %arg0, %c0_i32 : i32, i32
  }
  func.func @transform_1(%arg0: i32, %arg1: i32) -> (i32, i32) {
    %c0_i32 = arith.constant 0 : i32
    return %arg0, %arg1 : i32, i32
  }
  func.func @transform_2(%arg0: i32, %arg1: i32) -> (i32, i32) {
    %c0_i32 = arith.constant 0 : i32
    return %arg0, %arg1 : i32, i32
  }
}

</mosaic_0001>

<bundles_post_ra>
// kernel: discriminator_forward.2
= control target key start
LH: loop header
LB: loop body
LE: loop exit
PB: predicated region body
PF: predicated region fallthrough
CT: control target
= control target key end

     0   :  { %s547_s9 = smov 0   ;;  %s549_s10 = smov 0   ;;  %s631_s0 = inlined_call_operand.vmem [shape: f32[32,2], index: 0, kind: input, shape index: {}]   ;;  %s632_s1 = inlined_call_operand.vmem [shape: f32[32,256], index: 1, kind: input, shape index: {}]   ;;  %s633_s2 = inlined_call_operand.vmem [shape: f32[32,256], index: 2, kind: output, shape index: {}]  }
   0x1   :  { %s551_s11 = smov 0   ;;  %s553_s12 = smov 0  }
   0x2   :  { %s555_s13 = smov 0  }
   0x3 LB: > { %s21_s14 = sadd.s32 1, %s524_s12  ;;  %s429_s15 = sadd.s32 4294967295, %s528_s13   ;;  %s528_s13 = sphi %s555_s13, %s12_s13   ;;  %s524_s12 = sphi %s553_s12, %s638_s12   ;;  %s520_s11 = sphi %s551_s11, %s637_s11   ;;  %s516_s10 = sphi %s549_s10, %s636_s10   ;;  %s512_s9 = sphi %s547_s9, %s635_s9  }
   0x4   : > { %p22_p0 = scmp.ge.s32.totalorder %s21_s14, 2  ;;  %p66_p1 = scmp.ne.s32.totalorder %s516_s10, %s512_s9 }
   0x5   : > { %p67_p2 = scmp.eq.s32.totalorder %s528_s13, 0  ;;  %p98_p4 = scmp.eq.s32.totalorder %s429_s15, 1 }
   0x6   : > { %s640_s14 = smov (%p22_p0, %s21_s14), 0  ;;  %s59_s17 = sadd.s32 1, %s516_s10 }
   0x7   : > { %p68_p3 = por %p67_p2, %p66_p1  ;;  %s55_s16 = ssub.s32 %s524_s12, %s640_s14 }
   0x8   : > { %p57_p5 = scmp.eq.s32.totalorder %s55_s16, 0  ;;  %p582_p6 = por %p98_p4, %p66_p1 }
   0x9   : > { %p433_p7 = scmp.ge.s32.totalorder %s528_s13, 2 }
   0xa   : > { %s587_s19 = scalar_select %p57_p5, %s516_s10, %s59_s17  }
   0xb   : > { %129 = sbr.rel (%p433_p7) target bundleno = 24 (0x18), region = 20 }
  0x10   : > { %132 = sbr.rel (!%p68_p3) target bundleno = 24 (0x18), region = 24  ;;  %s134_s20 = sand.u32 (%p68_p3), 1, %s516_s10  }
  0x11   : > { %s435_s21 = sshll.u32 (%p68_p3), %s524_s12, 3  ;;  %s434_s22 = sshll.u32 (%p68_p3), %s134_s20, 5 }
  0x12   : > { %s141_s25 = scalar_lea.vmem (%p68_p3), %s632_s1, %s435_s21  ;;  %s136_s26 = scalar_lea.vmem (%p68_p3), [#allocation2], %s434_s22 }
  0x13   : > { %v176_v0 = vld [vmem:[%s141_s25] sm:$0xff] (%p68_p3)  ;;  %v178_v1 = vld [vmem:[%s141_s25 + $0x10] sm:$0xff] (%p68_p3) }
  0x14   : > { %v180_v2 = vld [vmem:[%s141_s25 + $0x20] sm:$0xff] (%p68_p3)  ;;  %177 = vst [vmem:[%s136_s26] sm:$0xff] (%p68_p3), %v176_v0  ;;  %v182_v3 = vld [vmem:[%s141_s25 + $0x30] sm:$0xff] (%p68_p3) }
  0x15   : > { %179 = vst [vmem:[%s136_s26 + $0x8] sm:$0xff] %v178_v1 }
  0x16   : > { %181 = vst [vmem:[%s136_s26 + $0x10] sm:$0xff] %v180_v2 }
  0x17   : > { %183 = vst [vmem:[%s136_s26 + $0x18] sm:$0xff] %v182_v3 }
  0x18 PF: > { %p436_p8 = scmp.ge.s32.totalorder %s528_s13, 1  ;;  %p188_p9 = scmp.lt.s32.totalorder %s528_s13, 3 }
  0x1a   : > { %p189_p10 = pnand %p436_p8, %p188_p9 }
  0x1b   : > { %s195_s7 = sand.u32 (!%p189_p10), 1, %s512_s9  }
  0x1c   : > { %192 = sbr.rel (%p189_p10) target bundleno = 179 (0xb3), region = 62  ;;  %s437_s8 = sshll.u32 (!%p189_p10), %s195_s7, 5 }
  0x1d   : > { %s197_s15 = scalar_lea.vmem (!%p189_p10), [#allocation2], %s437_s8  ;;  %s219_s16 = scalar_lea.vmem (!%p189_p10), [#allocation3], %s437_s8 }
  0x21   : > { %v238_v4 = vld [vmem:[%s631_s0 + $0x10] sm:$0xff]  ;;  %v236_v5 = vld [vmem:[%s631_s0] sm:$0xff]  ;;  %v530_v6 = vmov 0   ;;  %v531_v7 = vmov 1   ;;  %v239_v8 = vld [vmem:[%s631_s0 + $0x18] sm:$0xff]  ;;  %s440_s9 = sshll.u32 (%p582_p6), %s520_s11, 3 }
  0x22   : > { %486 = vset.pattern.permute.xlu1 %v530_v6  ;;  %485 = vset.pattern.permute.xlu0 %v530_v6  ;;  %v237_v9 = vld [vmem:[%s631_s0 + $0x8] sm:$0xff]  ;;  %v228_v10 = vld [vmem:[%s197_s15] sm:$0xff]  ;;  %v230_v22 = vld [vmem:[%s197_s15 + $0x10] sm:$0xff]  ;;  %s299_s21 = scalar_lea.vmem (%p582_p6), %s633_s2, %s440_s9 }
  0x23   : > { %252 = vperm.xlu1 %486, %v238_v4   ;;  %242 = vperm.xlu0 %485, %v236_v5   ;;  %v232_v11 = vmax.f32 %v228_v10, 0.0  ;;  %v229_v16 = vld [vmem:[%s197_s15 + $0x8] sm:$0xff]  ;;  %v231_v23 = vld [vmem:[%s197_s15 + $0x18] sm:$0xff]  ;;  %v234_v26 = vmax.f32 %v230_v22, 0.0 }
  0x24   : > { %487 = vset.pattern.permute.xlu2 %v531_v7  ;;  %v233_v18 = vmax.f32 %v229_v16, 0.0  ;;  %v235_v27 = vmax.f32 %v231_v23, 0.0 }
  0x25   : > { %265 = vperm.xlu2 %487, %v236_v5  }
  0x2b   : > { %257 = vperm.xlu1 %486, %v239_v8   ;;  %247 = vperm.xlu0 %485, %v237_v9  }
  0x2d   : > { %269 = vperm.xlu2 %487, %v237_v9  }
  0x33   : > { %489 = vset.pattern.permute.xlu1 %v531_v7  ;;  %488 = vset.pattern.permute.xlu0 %v531_v7 }
  0x34   : > { %277 = vperm.xlu1 %489, %v239_v8   ;;  %273 = vperm.xlu0 %488, %v238_v4  }
  0x7f   : > { %v266_v12 = vpop.permute.xlu2 %265 }
  0x87   : > { %v270_v19 = vpop.permute.xlu2 %269 }
  0x95   : > { %v253_v13 = vpop.permute.xlu1 %252  ;;  %v243_v14 = vpop.permute.xlu0 %242 }
  0x96   : > { %v260_v15 = vmul.f32 %v243_v14, %v232_v11  ;;  %v262_v28 = vmul.f32 %v253_v13, %v234_v26 }
  0x98   : > { %v280_v17 = vadd.f32 %v266_v12, %v260_v15 }
  0x9a   : > { %284 = vst [vmem:[%s219_s16] sm:$0xff] %v280_v17 }
  0x9d   : > { %v258_v20 = vpop.permute.xlu1 %257  ;;  %v248_v21 = vpop.permute.xlu0 %247 }
  0x9e   : > { %v261_v24 = vmul.f32 %v248_v21, %v233_v18  ;;  %v263_v29 = vmul.f32 %v258_v20, %v235_v27 }
  0xa0   : > { %v281_v25 = vadd.f32 %v270_v19, %v261_v24 }
  0xa1   : > { %v334_v34 = vld [vmem:[%s219_s16] sm:$0xff] (%p582_p6) }
  0xa2   : > { %285 = vst [vmem:[%s219_s16 + $0x8] sm:$0xff] %v281_v25 }
  0xa3   : > { %335 = vst [vmem:[%s299_s21] sm:$0xff] (%p582_p6), %v334_v34 }
  0xa6   : > { %v278_v30 = vpop.permute.xlu1 %277  ;;  %v274_v31 = vpop.permute.xlu0 %273  ;;  %294 = sbr.rel (!%p582_p6) target bundleno = 179 (0xb3), region = 70 }
  0xa7   : > { %v283_v32 = vadd.f32 %v278_v30, %v263_v29  ;;  %v282_v33 = vadd.f32 %v274_v31, %v262_v28 }
  0xa9   : > { %287 = vst [vmem:[%s219_s16 + $0x18] sm:$0xff] %v283_v32  ;;  %v336_v35 = vld [vmem:[%s219_s16 + $0x8] sm:$0xff] (%p582_p6) }
  0xaa   : > { %286 = vst [vmem:[%s219_s16 + $0x10] sm:$0xff] %v282_v33 }
  0xab   : > { %337 = vst [vmem:[%s299_s21 + $0x10] sm:$0xff] %v336_v35 }
  0xb0   : > { %v340_v37 = vld [vmem:[%s219_s16 + $0x18] sm:$0xff] }
  0xb1   : > { %v338_v36 = vld [vmem:[%s219_s16 + $0x10] sm:$0xff]  ;;  %341 = vst [vmem:[%s299_s21 + $0x30] sm:$0xff] %v340_v37 }
  0xb2   : > { %339 = vst [vmem:[%s299_s21 + $0x20] sm:$0xff] %v338_v36 }
  0xb3 PF: > { %s12_s13 = sadd.s32 1, %s528_s13   ;;  %s635_s9 = smov %s516_s10 }
  0xb4   : > { %p9_p11 = scmp.ge.s32.totalorder %s12_s13, 4   ;;  %s636_s10 = smov %s587_s19 }
  0xb5   : > { %s637_s11 = smov %s524_s12  ;;  %s638_s12 = smov %s640_s14 }
  0xb6   :  { %11 = sbr.rel (!%p9_p11) target bundleno = 3 (0x3), region = 142 }

// kernel: discriminator_forward.3
= control target key start
LH: loop header
LB: loop body
LE: loop exit
PB: predicated region body
PF: predicated region fallthrough
CT: control target
= control target key end

     0   :  { %s437_s9 = smov 0   ;;  %s439_s10 = smov 0   ;;  %s478_s0 = inlined_call_operand.vmem [shape: f32[64,2], index: 0, kind: input, shape index: {}]   ;;  %s479_s1 = inlined_call_operand.vmem [shape: f32[64,64], index: 1, kind: input, shape index: {}]   ;;  %s480_s2 = inlined_call_operand.vmem [shape: f32[64,64], index: 2, kind: output, shape index: {}]  }
   0x1   :  { %s441_s11 = smov 0  }
   0x2 LB: > { %s24_s12 = sadd.s32 1, %s414_s10  ;;  %p355_p0 = scmp.ge.s32.totalorder %s418_s11, 1  ;;  %s418_s11 = sphi %s441_s11, %s12_s11   ;;  %s414_s10 = sphi %s439_s10, %s482_s10   ;;  %s410_s9 = sphi %s437_s9, %s481_s9  }
   0x3   : > { %p26_p1 = scmp.ge.s32.totalorder %s24_s12, 2  ;;  %p143_p2 = scmp.lt.s32.totalorder %s418_s11, 3 }
   0x5   : > { %s484_s12 = smov (%p26_p1, %s24_s12), 0  ;;  %p144_p3 = pnand %p355_p0, %p143_p2 }
   0x6   : > { %s356_s13 = sshll.u32 (!%p144_p3), %s410_s9, 2 }
   0x7   : > { %147 = sbr.rel (%p144_p3) target bundleno = 152 (0x98), region = 28  ;;  %p177_p4 = scmp.lt.s32.totalorder (!%p144_p3), %s356_s13, 7 }
   0xc   : > { %v420_v0 = vmov 0   ;;  %s486_s13 = smov (!%p177_p4, %s356_s13), 7  ;;  %v421_v5 = vmov 1   ;;  %vm256_vm0 = vcmask 523264  }
   0xd   : > { %391 = vset.pattern.permute.xlu1 %v420_v0  ;;  %390 = vset.pattern.permute.xlu0 %v420_v0  ;;  %s455_s14 = sshll.u32 %s486_s13, 3 }
   0xe   : > { %393 = vset.pattern.permute.xlu2 %v420_v0  ;;  %s180_s17 = scalar_lea.vmem %s478_s0, %s455_s14  ;;  %s189_s20 = scalar_lea.vmem %s479_s1, %s455_s14 }
   0xf   : > { %v210_v1 = vld [vmem:[%s180_s17 + $0x10] sm:$0xff]  ;;  %v208_v2 = vld [vmem:[%s180_s17] sm:$0xff]  ;;  %v211_v3 = vld [vmem:[%s180_s17 + $0x18] sm:$0xff]  ;;  %s198_s23 = scalar_lea.vmem %s480_s2, %s455_s14 }
  0x10   : > { %224 = vperm.xlu1 %391, %v210_v1   ;;  %214 = vperm.xlu0 %390, %v208_v2   ;;  %v209_v4 = vld [vmem:[%s180_s17 + $0x8] sm:$0xff]  ;;  %v200_v9 = vld [vmem:[%s189_s20] sm:$0xff]  ;;  %v202_v16 = vld [vmem:[%s189_s20 + $0x10] sm:$0xff] }
  0x11   : > { %229 = vperm.xlu2 %393, %v211_v3   ;;  %v201_v10 = vld [vmem:[%s189_s20 + $0x8] sm:$0xff]  ;;  %v204_v11 = vmax.f32 %v200_v9, 0.0  ;;  %v203_v17 = vld [vmem:[%s189_s20 + $0x18] sm:$0xff]  ;;  %v206_v22 = vmax.f32 %v202_v16, 0.0 }
  0x12   : > { %v205_v12 = vmax.f32 %v201_v10, 0.0  ;;  %v207_v23 = vmax.f32 %v203_v17, 0.0 }
  0x18   : > { %392 = vset.pattern.permute.xlu1 %v421_v5  ;;  %219 = vperm.xlu0 %390, %v209_v4  }
  0x19   : > { %237 = vperm.xlu1 %392, %v208_v2   ;;  %394 = vset.pattern.permute.xlu2 %v421_v5 }
  0x1a   : > { %241 = vperm.xlu2 %394, %v209_v4  }
  0x20   : > { %395 = vset.pattern.permute.xlu0 %v421_v5 }
  0x21   : > { %249 = vperm.xlu1 %392, %v211_v3   ;;  %245 = vperm.xlu0 %395, %v210_v1  }
  0x6b   : > { %v230_v6 = vpop.permute.xlu2 %229 }
  0x6c   : > { %v235_v25 = vmul.f32 %v230_v6, %v207_v23 }
  0x74   : > { %v242_v15 = vpop.permute.xlu2 %241 }
  0x82   : > { %v215_v7 = vpop.permute.xlu0 %214  ;;  %v225_v8 = vpop.permute.xlu1 %224 }
  0x83   : > { %v232_v13 = vmul.f32 %v215_v7, %v204_v11  ;;  %v234_v24 = vmul.f32 %v225_v8, %v206_v22 }
  0x8a   : > { %v220_v14 = vpop.permute.xlu0 %219 }
  0x8b   : > { %v233_v18 = vmul.f32 %v220_v14, %v205_v12  ;;  %v238_v19 = vpop.permute.xlu1 %237 }
  0x8c   : > { %v252_v20 = vadd.f32 %v238_v19, %v232_v13 }
  0x8d   : > { %v253_v21 = vadd.f32 %v242_v15, %v233_v18 }
  0x8e   : > { %257 = vst.msk [vmem:[%s198_s23] sm:$0xff] %vm256_vm0, %v252_v20 }
  0x8f   : > { %258 = vst.msk [vmem:[%s198_s23 + $0x8] sm:$0xff] %vm256_vm0, %v253_v21 }
  0x93   : > { %v250_v26 = vpop.permute.xlu1 %249  ;;  %v246_v27 = vpop.permute.xlu0 %245 }
  0x94   : > { %v255_v28 = vadd.f32 %v250_v26, %v235_v25  ;;  %v254_v29 = vadd.f32 %v246_v27, %v234_v24 }
  0x96   : > { %259 = vst.msk [vmem:[%s198_s23 + $0x10] sm:$0xff] %vm256_vm0, %v254_v29 }
  0x97   : > { %260 = vst.msk [vmem:[%s198_s23 + $0x18] sm:$0xff] %vm256_vm0, %v255_v28 }
  0x98 PF: > { %s12_s11 = sadd.s32 1, %s418_s11   ;;  %s481_s9 = smov %s414_s10 }
  0x99   : > { %p9_p5 = scmp.ge.s32.totalorder %s12_s11, 4   ;;  %s482_s10 = smov %s484_s12 }
  0x9b   :  { %11 = sbr.rel (!%p9_p5) target bundleno = 2 (0x2), region = 61 }

</bundles_post_ra>
